<compile_context>
chip_gen: v7x
topology: tpu7x:2x2x1
jax: 0.10.0
libtpu: 0.0.40
codegen_flags: <defaults>
</compile_context>

<pallas_src>
import functools

import jax
import jax.numpy as jnp
from jax.experimental import pallas as pl
from jax.experimental.pallas import tpu as pltpu


def _round_up(x, m):
    return ((x + m - 1) // m) * m


def _cdiv(a, b):
    return -(-a // b)


def _vmem_limits():
    """(planning_budget, vmem_limit_bytes) from the physical VMEM of the
    current generation (v5e/v6e ~128 MiB, v7x ~64 MiB per TensorCore)."""
    try:
        cap = int(pltpu.get_tpu_info().vmem_capacity_bytes)
    except Exception:
        cap = 64 << 20                              # conservative (v7x-sized) fallback
    if cap <= 0:
        cap = 64 << 20
    budget = min((cap * 7) // 10, 96 << 20)         # plan against ~70% of physical
    limit = min((cap * 17) // 20, 112 << 20)        # scoped-VMEM limit, with headroom
    return budget, limit


def _choose_plan(n_rows, l_pad, h_pad, x_isz, w_isz, dec_isz, budget):
    """Pick (tile_n, tile_h).  tile_h == h_pad means fully weight-resident."""
    n_cap = _round_up(max(n_rows, 1), 8)
    row_cands = (4096, 2048, 1024, 768, 512, 256, 128, 64, 32, 16, 8)

    def resident_fits(tn):
        weights = 2 * w_isz * 2 * l_pad * h_pad + 2 * 4 * (h_pad + l_pad)
        io = 2 * tn * l_pad * (x_isz + dec_isz) + 2 * 4 * 8 * h_pad
        inter = 4 * tn * (h_pad + l_pad)            # f32 h / dec temporaries
        return weights + io + inter <= budget

    def htiled_fits(tn, th):
        weights = 2 * w_isz * 2 * l_pad * th + 2 * 4 * (th + l_pad)
        io = 2 * tn * l_pad * (x_isz + dec_isz) + 2 * 4 * 8 * th
        scratch = 4 * tn * l_pad                    # f32 decoded accumulator
        inter = 4 * tn * (th + l_pad)
        return weights + io + scratch + inter <= budget

    tn_res = next((min(c, n_cap) for c in row_cands if resident_fits(min(c, n_cap))), None)
    if tn_res is not None and tn_res >= min(512, n_cap):
        return tn_res, h_pad

    # Weights don't fit (or force tiny row tiles): stream them in H blocks.
    h_cands = [c for c in (4096, 2048, 1024, 512, 256, 128)
               if c <= h_pad and h_pad % c == 0]    # must divide -> no ragged H block
    for tn_c in row_cands:
        tn = min(tn_c, n_cap)
        for th in h_cands:
            if htiled_fits(tn, th):
                return tn, th
    raise ValueError(
        "SparseAE Pallas kernel: no (tile_n, tile_h) plan fits the VMEM budget "
        f"of {budget} bytes (L_pad={l_pad}, H_pad={h_pad}).")


def _row_group_sum(h):
    """(tile_n, W) f32 -> (8, W) f32 partial column sums over sublane groups.

    The reshape is layout-preserving ((8,128) native tiles group along the
    sublane axis), so the reduce is plain VPU adds, not a full XLU reduce."""
    tn, w = h.shape
    return h.reshape(tn // 8, 8, w).sum(axis=0)


def _masked_row_group_sum(h, tile_n, n_rows, tile_index):
    row = tile_index * tile_n + jax.lax.broadcasted_iota(jnp.int32, (tile_n, 1), 0)
    return _row_group_sum(jnp.where(row < n_rows, h, 0.0))


# --------------------------------------------------------------------------
# Kernel A: weights fully VMEM-resident, grid over row tiles only.
# --------------------------------------------------------------------------
def _ae_kernel_resident(x_ref, w1_ref, b1_ref, w2_ref, b2_ref, dec_ref, hsum_ref,
                        *, tile_n, n_rows, num_tiles, compute_dtype, ragged):
    # Encoder: Linear + ReLU.  bf16 operands, f32 MXU accumulation, f32 epilogue.
    x = x_ref[...].astype(compute_dtype)
    h = jnp.dot(x, w1_ref[...], preferred_element_type=jnp.float32)
    h = jnp.maximum(h + b1_ref[...], 0.0)

    # Decoder: Linear.
    dec = jnp.dot(h.astype(compute_dtype), w2_ref[...],
                  preferred_element_type=jnp.float32) + b2_ref[...]
    dec_ref[...] = dec.astype(dec_ref.dtype)

    # Per-tile hidden-activation partial sums; the row mask only matters (and
    # is only applied) on the last, ragged row tile.
    if ragged:
        i = pl.program_id(0)

        @pl.when(i < num_tiles - 1)
        def _():
            hsum_ref[...] = _row_group_sum(h)

        @pl.when(i == num_tiles - 1)
        def _():
            hsum_ref[...] = _masked_row_group_sum(h, tile_n, n_rows, i)
    else:
        hsum_ref[...] = _row_group_sum(h)


# --------------------------------------------------------------------------
# Kernel B: H-tiled (weights streamed per H block), f32 decoded accumulator.
# --------------------------------------------------------------------------
def _ae_kernel_htiled(x_ref, w1_ref, b1_ref, w2_ref, b2_ref, dec_ref, hsum_ref,
                      acc_ref, *, tile_n, n_rows, num_row_tiles, num_h_tiles,
                      compute_dtype, ragged):
    j = pl.program_id(1)

    x = x_ref[...].astype(compute_dtype)
    h = jnp.dot(x, w1_ref[...], preferred_element_type=jnp.float32)
    h = jnp.maximum(h + b1_ref[...], 0.0)            # h for this H block only

    @pl.when(j == 0)
    def _():
        acc_ref[...] = jnp.zeros_like(acc_ref)

    acc_ref[...] += jnp.dot(h.astype(compute_dtype), w2_ref[...],
                            preferred_element_type=jnp.float32)

    @pl.when(j == num_h_tiles - 1)
    def _():
        dec_ref[...] = (acc_ref[...] + b2_ref[...]).astype(dec_ref.dtype)

    if ragged:
        i = pl.program_id(0)

        @pl.when(i < num_row_tiles - 1)
        def _():
            hsum_ref[...] = _row_group_sum(h)

        @pl.when(i == num_row_tiles - 1)
        def _():
            hsum_ref[...] = _masked_row_group_sum(h, tile_n, n_rows, i)
    else:
        hsum_ref[...] = _row_group_sum(h)


def _pad_cast_2d(a, rows, cols, dtype):
    a = a.astype(dtype)
    if a.shape == (rows, cols):
        return a
    return jnp.zeros((rows, cols), dtype).at[:a.shape[0], :a.shape[1]].set(a)


def _weight_spec(shape, index_map, *, single_buffer):
    if single_buffer:
        # Constant index_map -> one VMEM buffer is enough; halves weight VMEM.
        return pl.BlockSpec(shape, index_map, pipeline_mode=pl.Buffered(1))
    return pl.BlockSpec(shape, index_map)


def sparse_ae_forward(x, params, running_mean, *, momentum, sparsity_lambda,
                      compute_dtype=jnp.bfloat16,
                      force_tile_n=None, force_tile_h=None):
    """Functional equivalent of SparseAE.forward.

    Returns (decoded (B, C, L) in `compute_dtype`, sparsity_loss scalar f32,
    new_running_mean (H,) f32).  Use compute_dtype=jnp.float32 for exact fp32
    parity with the PyTorch module (at ~2x the HBM traffic)."""
    B, C, L = x.shape
    N = B * C
    H = params["w1"].shape[1]
    out_dim = params["w2"].shape[1]
    assert out_dim == L, "out_dim must equal L so decoded can be viewed as (B, C, L)"
    assert H > L, "sparse_hidden_dim must be larger than input_dim"

    f32 = jnp.float32
    L_pad = _round_up(L, 128)
    H_pad = _round_up(H, 128)

    x_isz = jnp.dtype(x.dtype).itemsize if L == L_pad else jnp.dtype(compute_dtype).itemsize
    w_isz = jnp.dtype(compute_dtype).itemsize
    dec_isz = jnp.dtype(compute_dtype).itemsize

    budget, vmem_limit = _vmem_limits()
    tile_n, tile_h = _choose_plan(N, L_pad, H_pad, x_isz, w_isz, dec_isz, budget)
    # Keep >= 2 row tiles for large N so both v7x TensorCores get work; never
    # shrink below 512 rows (85%+ of HBM roofline needs big tiles).
    tile_n = min(tile_n, max(512, _round_up(_cdiv(N, 2), 8)))
    if force_tile_n is not None:
        tile_n = force_tile_n
    if force_tile_h is not None:
        tile_h = force_tile_h

    num_tiles = _cdiv(N, tile_n)
    num_h_tiles = H_pad // tile_h
    ragged = (N % tile_n) != 0

    # Operand prep.  x is padded only if L is not lane-aligned (the cast is
    # fused into the padding copy); otherwise it is passed through untouched
    # and cast per-tile inside the kernel (cheaper than a separate cast pass).
    x2 = x.reshape(N, L)
    if L == L_pad:
        x_in = x2
    else:
        x_in = jnp.zeros((N, L_pad), compute_dtype).at[:, :L].set(x2.astype(compute_dtype))
    w1_p = _pad_cast_2d(params["w1"], L_pad, H_pad, compute_dtype)
    b1_p = _pad_cast_2d(params["b1"].reshape(1, H), 1, H_pad, f32)
    w2_p = _pad_cast_2d(params["w2"], H_pad, L_pad, compute_dtype)
    b2_p = _pad_cast_2d(params["b2"].reshape(1, out_dim), 1, L_pad, f32)

    out_shape = (jax.ShapeDtypeStruct((N, L_pad), compute_dtype),
                 jax.ShapeDtypeStruct((num_tiles * 8, H_pad), f32))

    if tile_h == H_pad:
        # ---------------- weight-resident plan ----------------
        kern = functools.partial(_ae_kernel_resident, tile_n=tile_n, n_rows=N,
                                 num_tiles=num_tiles, compute_dtype=compute_dtype,
                                 ragged=ragged)
        cparams = pltpu.CompilerParams(dimension_semantics=("parallel",),
                                       vmem_limit_bytes=int(vmem_limit))

        def _run(single_buffer_weights):
            wspec = functools.partial(_weight_spec, single_buffer=single_buffer_weights)
            return pl.pallas_call(
                kern,
                out_shape=out_shape,
                grid=(num_tiles,),
                in_specs=[
                    pl.BlockSpec((tile_n, L_pad), lambda i: (i, 0)),   # x (pipelined)
                    wspec((L_pad, H_pad), lambda i: (0, 0)),           # w1 (resident)
                    wspec((1, H_pad), lambda i: (0, 0)),               # b1 (resident)
                    wspec((H_pad, L_pad), lambda i: (0, 0)),           # w2 (resident)
                    wspec((1, L_pad), lambda i: (0, 0)),               # b2 (resident)
                ],
                out_specs=(
                    pl.BlockSpec((tile_n, L_pad), lambda i: (i, 0)),   # decoded tile
                    pl.BlockSpec((8, H_pad), lambda i: (i, 0)),        # hidden partials
                ),
                compiler_params=cparams,
            )(x_in, w1_p, b1_p, w2_p, b2_p)

        try:
            dec_p, hsum = _run(True)
        except Exception:
            # pipeline_mode=pl.Buffered(1) not supported on this jax version /
            # backend -> fall back to default (double-buffered) weight specs.
            dec_p, hsum = _run(False)
    else:
        # ---------------- H-tiled plan (weights streamed) ----------------
        kern = functools.partial(_ae_kernel_htiled, tile_n=tile_n, n_rows=N,
                                 num_row_tiles=num_tiles, num_h_tiles=num_h_tiles,
                                 compute_dtype=compute_dtype, ragged=ragged)
        cparams = pltpu.CompilerParams(dimension_semantics=("parallel", "arbitrary"),
                                       vmem_limit_bytes=int(vmem_limit))
        dec_p, hsum = pl.pallas_call(
            kern,
            out_shape=out_shape,
            grid=(num_tiles, num_h_tiles),
            in_specs=[
                pl.BlockSpec((tile_n, L_pad), lambda i, j: (i, 0)),    # x (fetched per i)
                pl.BlockSpec((L_pad, tile_h), lambda i, j: (0, j)),    # w1 H block
                pl.BlockSpec((1, tile_h), lambda i, j: (0, j)),        # b1 H block
                pl.BlockSpec((tile_h, L_pad), lambda i, j: (j, 0)),    # w2 H block
                pl.BlockSpec((1, L_pad), lambda i, j: (0, 0)),         # b2 (resident)
            ],
            out_specs=(
                pl.BlockSpec((tile_n, L_pad), lambda i, j: (i, 0)),    # decoded tile
                pl.BlockSpec((8, tile_h), lambda i, j: (i, j)),        # hidden partials
            ),
            scratch_shapes=[pltpu.VMEM((tile_n, L_pad), jnp.float32)],
            compiler_params=cparams,
        )(x_in, w1_p, b1_p, w2_p, b2_p)

    decoded = dec_p if L == L_pad else dec_p[:, :L]
    decoded = decoded.reshape(B, C, L)

    # O(H) epilogue in plain JAX: batch mean, EMA, Bernoulli KL (matches
    # torch.distributions.kl_divergence(Bernoulli(sigmoid(run)), Bernoulli(q)).sum()).
    act_mean = hsum[:, :H].sum(axis=0) / jnp.float32(N)
    new_run = momentum * running_mean.astype(f32) + (1.0 - momentum) * act_mean
    p = jax.nn.sigmoid(new_run)
    q = jnp.float32(sparsity_lambda)
    kl = p * (jnp.log(p) - jnp.log(q)) + (1.0 - p) * (jnp.log1p(-p) - jnp.log1p(-q))
    sparsity_loss = jnp.sum(kl)

    return decoded, sparsity_loss, new_run


def _reference(x, params, running_mean, momentum, q):
    B, C, L = x.shape
    x2 = x.reshape(B * C, L).astype(jnp.float32)
    h = jnp.maximum(x2 @ params["w1"] + params["b1"], 0.0)
    dec = (h @ params["w2"] + params["b2"]).reshape(B, C, L)
    run = momentum * running_mean + (1.0 - momentum) * h.mean(axis=0)
    p = jax.nn.sigmoid(run)
    kl = jnp.sum(p * (jnp.log(p) - jnp.log(q))
                 + (1.0 - p) * (jnp.log1p(-p) - jnp.log1p(-q)))
    return dec, kl, run


def _make_inputs(key, B, C, L, H):
    kx, k1, k2, k3, k4 = jax.random.split(key, 5)
    # nn.Linear stores (out, in); transposed (in, out) layout kept for x @ W.
    params = {
        "w1": 0.1 * jax.random.normal(k1, (L, H), dtype=jnp.float32),
        "b1": 0.01 * jax.random.normal(k2, (H,), dtype=jnp.float32),
        "w2": 0.1 * jax.random.normal(k3, (H, L), dtype=jnp.float32),
        "b2": 0.01 * jax.random.normal(k4, (L,), dtype=jnp.float32),
    }
    x = jax.random.normal(kx, (B, C, L), dtype=jnp.float32)
    running_mean = jnp.zeros((H,), dtype=jnp.float32)   # train_running_mean_activation
    return x, params, running_mean


if __name__ == "__main__":
    momentum = 0.9
    sparsity_lambda = 0.05
    key = jax.random.PRNGKey(0)
    k_a, k_b = jax.random.split(key)

    # --- Test 1: default performant path (bf16 I/O, weight-resident plan). ---
    B, C, L, H = 2, 4, 16, 32
    x, params, run0 = _make_inputs(k_a, B, C, L, H)
    dec, kl, run = sparse_ae_forward(x, params, run0, momentum=momentum,
                                     sparsity_lambda=sparsity_lambda)
    jax.block_until_ready((dec, kl, run))
    dec_r, kl_r, run_r = _reference(x, params, run0, momentum, sparsity_lambda)
    assert dec.shape == (B, C, L) and run.shape == (H,) and kl.shape == ()
    assert jnp.allclose(dec.astype(jnp.float32), dec_r, atol=3e-2, rtol=3e-2), "bf16 decoded mismatch"
    assert jnp.allclose(run, run_r, atol=1e-2, rtol=1e-2), "bf16 running-mean mismatch"
    assert jnp.allclose(kl, kl_r, atol=5e-2, rtol=1e-2), "bf16 sparsity-loss mismatch"

    # --- Test 2: fp32 parity path (same plan, exact semantics). ---
    dec32, kl32, run32 = sparse_ae_forward(x, params, run0, momentum=momentum,
                                           sparsity_lambda=sparsity_lambda,
                                           compute_dtype=jnp.float32)
    jax.block_until_ready((dec32, kl32, run32))
    assert jnp.allclose(dec32, dec_r, atol=1e-4, rtol=1e-5), "fp32 decoded mismatch"
    assert jnp.allclose(run32, run_r, atol=1e-5, rtol=1e-5), "fp32 running-mean mismatch"
    assert jnp.allclose(kl32, kl_r, atol=1e-4, rtol=1e-5), "fp32 sparsity-loss mismatch"

    # --- Test 3: H-tiled fallback + ragged last row tile (forced small tiles). ---
    B2, C2, L2, H2 = 2, 5, 16, 256          # N = 10 rows -> ragged with tile_n = 8
    x2, params2, run02 = _make_inputs(k_b, B2, C2, L2, H2)
    dec_h, kl_h, run_h = sparse_ae_forward(x2, params2, run02, momentum=momentum,
                                           sparsity_lambda=sparsity_lambda,
                                           compute_dtype=jnp.float32,
                                           force_tile_n=8, force_tile_h=128)
    jax.block_until_ready((dec_h, kl_h, run_h))
    dec_hr, kl_hr, run_hr = _reference(x2, params2, run02, momentum, sparsity_lambda)
    assert dec_h.shape == (B2, C2, L2) and run_h.shape == (H2,)
    assert jnp.allclose(dec_h, dec_hr, atol=1e-4, rtol=1e-5), "H-tiled decoded mismatch"
    assert jnp.allclose(run_h, run_hr, atol=1e-5, rtol=1e-5), "H-tiled running-mean mismatch"
    assert jnp.allclose(kl_h, kl_hr, atol=1e-4, rtol=1e-5), "H-tiled sparsity-loss mismatch"

    print("KERNEL_OK")
</pallas_src>

<mosaic_0001>
module attributes {stable_mosaic.version = 11 : i64} {
  func.func @_ae_kernel_resident(%arg0: i32, %arg1: memref<8x128xbf16, #tpu.memory_space<vmem>>, %arg2: memref<128x128xbf16, #tpu.memory_space<vmem>>, %arg3: memref<1x128xf32, #tpu.memory_space<vmem>>, %arg4: memref<128x128xbf16, #tpu.memory_space<vmem>>, %arg5: memref<1x128xf32, #tpu.memory_space<vmem>>, %arg6: memref<8x128xbf16, #tpu.memory_space<vmem>>, %arg7: memref<8x128xf32, #tpu.memory_space<vmem>>) attributes {dimension_semantics = [#tpu.dimension_semantics<parallel>], iteration_bounds = array<i64: 1>, scalar_prefetch = 0 : i64, scratch_operands = 0 : i64, tpu.core_type = #tpu.core_type<tc>, window_params = [{transform_indices = @transform_0, window_bounds = array<i64: 8, 128>}, {pipeline_mode = #tpu.pipeline_mode<synchronous>, transform_indices = @transform_1, window_bounds = array<i64: 128, 128>}, {pipeline_mode = #tpu.pipeline_mode<synchronous>, transform_indices = @transform_2, window_bounds = array<i64: 1, 128>}, {pipeline_mode = #tpu.pipeline_mode<synchronous>, transform_indices = @transform_3, window_bounds = array<i64: 128, 128>}, {pipeline_mode = #tpu.pipeline_mode<synchronous>, transform_indices = @transform_4, window_bounds = array<i64: 1, 128>}, {transform_indices = @transform_5, window_bounds = array<i64: 8, 128>}, {transform_indices = @transform_6, window_bounds = array<i64: 8, 128>}]} {
    %c0 = arith.constant 0 : index
    %c0_0 = arith.constant 0 : index
    %0 = vector.load %arg1[%c0, %c0_0] : memref<8x128xbf16, #tpu.memory_space<vmem>>, vector<8x128xbf16>
    %c0_1 = arith.constant 0 : index
    %c0_2 = arith.constant 0 : index
    %1 = vector.load %arg2[%c0_1, %c0_2] : memref<128x128xbf16, #tpu.memory_space<vmem>>, vector<128x128xbf16>
    %cst = arith.constant dense<0.000000e+00> : vector<8x128xf32>
    %2 = tpu.matmul %0, %1, %cst {dimension_numbers = #tpu.dot_dimension_numbers<[1], [0], [0], [1], [0, 0, 1, 1], [], []>} : vector<8x128xbf16>, vector<128x128xbf16>, vector<8x128xf32> -> vector<8x128xf32>
    %c0_3 = arith.constant 0 : index
    %c0_4 = arith.constant 0 : index
    %3 = vector.load %arg3[%c0_3, %c0_4] : memref<1x128xf32, #tpu.memory_space<vmem>>, vector<1x128xf32>
    %4 = vector.broadcast %3 : vector<1x128xf32> to vector<8x128xf32>
    %5 = arith.addf %2, %4 : vector<8x128xf32>
    %cst_5 = arith.constant 0.000000e+00 : f32
    %6 = vector.broadcast %cst_5 : f32 to vector<8x128xf32>
    %7 = arith.maximumf %5, %6 : vector<8x128xf32>
    %8 = arith.truncf %7 : vector<8x128xf32> to vector<8x128xbf16>
    %c0_6 = arith.constant 0 : index
    %c0_7 = arith.constant 0 : index
    %9 = vector.load %arg4[%c0_6, %c0_7] : memref<128x128xbf16, #tpu.memory_space<vmem>>, vector<128x128xbf16>
    %cst_8 = arith.constant dense<0.000000e+00> : vector<8x128xf32>
    %10 = tpu.matmul %8, %9, %cst_8 {dimension_numbers = #tpu.dot_dimension_numbers<[1], [0], [0], [1], [0, 0, 1, 1], [], []>} : vector<8x128xbf16>, vector<128x128xbf16>, vector<8x128xf32> -> vector<8x128xf32>
    %c0_9 = arith.constant 0 : index
    %c0_10 = arith.constant 0 : index
    %11 = vector.load %arg5[%c0_9, %c0_10] : memref<1x128xf32, #tpu.memory_space<vmem>>, vector<1x128xf32>
    %12 = vector.broadcast %11 : vector<1x128xf32> to vector<8x128xf32>
    %13 = arith.addf %10, %12 : vector<8x128xf32>
    %14 = arith.truncf %13 : vector<8x128xf32> to vector<8x128xbf16>
    %c0_11 = arith.constant 0 : index
    %c0_12 = arith.constant 0 : index
    %15 = vector.load %arg6[%c0_11, %c0_12] : memref<8x128xbf16, #tpu.memory_space<vmem>>, vector<8x128xbf16>
    tpu.vector_store %arg6[%c0_11, %c0_12], %14 {strides = array<i32>} : memref<8x128xbf16, #tpu.memory_space<vmem>>, vector<8x128xbf16>,
    %16 = vector.shape_cast %7 : vector<8x128xf32> to vector<1x8x128xf32>
    %cst_13 = arith.constant dense<0.000000e+00> : vector<8x128xf32>
    %17 = vector.multi_reduction <add>, %16, %cst_13 [0] : vector<1x8x128xf32> to vector<8x128xf32>
    %c0_14 = arith.constant 0 : index
    %c0_15 = arith.constant 0 : index
    %18 = vector.load %arg7[%c0_14, %c0_15] : memref<8x128xf32, #tpu.memory_space<vmem>>, vector<8x128xf32>
    tpu.vector_store %arg7[%c0_14, %c0_15], %17 {strides = array<i32>} : memref<8x128xf32, #tpu.memory_space<vmem>>, vector<8x128xf32>,
    return
  }
  func.func @transform_0(%arg0: i32) -> (i32, i32) {
    %c0_i32 = arith.constant 0 : i32
    %c0_i32_0 = arith.constant 0 : i32
    return %arg0, %c0_i32 : i32, i32
  }
  func.func @transform_1(%arg0: i32) -> (i32, i32) {
    %c0_i32 = arith.constant 0 : i32
    %c0_i32_0 = arith.constant 0 : i32
    %c0_i32_1 = arith.constant 0 : i32
    return %c0_i32, %c0_i32_0 : i32, i32
  }
  func.func @transform_2(%arg0: i32) -> (i32, i32) {
    %c0_i32 = arith.constant 0 : i32
    %c0_i32_0 = arith.constant 0 : i32
    %c0_i32_1 = arith.constant 0 : i32
    return %c0_i32, %c0_i32_0 : i32, i32
  }
  func.func @transform_3(%arg0: i32) -> (i32, i32) {
    %c0_i32 = arith.constant 0 : i32
    %c0_i32_0 = arith.constant 0 : i32
    %c0_i32_1 = arith.constant 0 : i32
    return %c0_i32, %c0_i32_0 : i32, i32
  }
  func.func @transform_4(%arg0: i32) -> (i32, i32) {
    %c0_i32 = arith.constant 0 : i32
    %c0_i32_0 = arith.constant 0 : i32
    %c0_i32_1 = arith.constant 0 : i32
    return %c0_i32, %c0_i32_0 : i32, i32
  }
  func.func @transform_5(%arg0: i32) -> (i32, i32) {
    %c0_i32 = arith.constant 0 : i32
    %c0_i32_0 = arith.constant 0 : i32
    return %arg0, %c0_i32 : i32, i32
  }
  func.func @transform_6(%arg0: i32) -> (i32, i32) {
    %c0_i32 = arith.constant 0 : i32
    %c0_i32_0 = arith.constant 0 : i32
    return %arg0, %c0_i32 : i32, i32
  }
}

module attributes {stable_mosaic.version = 11 : i64} {
  func.func @_ae_kernel_resident(%arg0: i32, %arg1: memref<8x128xbf16, #tpu.memory_space<vmem>>, %arg2: memref<128x128xbf16, #tpu.memory_space<vmem>>, %arg3: memref<1x128xf32, #tpu.memory_space<vmem>>, %arg4: memref<128x128xbf16, #tpu.memory_space<vmem>>, %arg5: memref<1x128xf32, #tpu.memory_space<vmem>>, %arg6: memref<8x128xbf16, #tpu.memory_space<vmem>>, %arg7: memref<8x128xf32, #tpu.memory_space<vmem>>) attributes {dimension_semantics = [#tpu.dimension_semantics<parallel>], iteration_bounds = array<i64: 1>, scalar_prefetch = 0 : i64, scratch_operands = 0 : i64, tpu.core_type = #tpu.core_type<tc>, window_params = [{transform_indices = @transform_0, window_bounds = array<i64: 8, 128>}, {pipeline_mode = #tpu.pipeline_mode<synchronous>, transform_indices = @transform_1, window_bounds = array<i64: 128, 128>}, {pipeline_mode = #tpu.pipeline_mode<synchronous>, transform_indices = @transform_2, window_bounds = array<i64: 1, 128>}, {pipeline_mode = #tpu.pipeline_mode<synchronous>, transform_indices = @transform_3, window_bounds = array<i64: 128, 128>}, {pipeline_mode = #tpu.pipeline_mode<synchronous>, transform_indices = @transform_4, window_bounds = array<i64: 1, 128>}, {transform_indices = @transform_5, window_bounds = array<i64: 8, 128>}, {transform_indices = @transform_6, window_bounds = array<i64: 8, 128>}]} {
    %c0 = arith.constant 0 : index
    %c0_0 = arith.constant 0 : index
    %0 = vector.load %arg1[%c0, %c0_0] : memref<8x128xbf16, #tpu.memory_space<vmem>>, vector<8x128xbf16>
    %c0_1 = arith.constant 0 : index
    %c0_2 = arith.constant 0 : index
    %1 = vector.load %arg2[%c0_1, %c0_2] : memref<128x128xbf16, #tpu.memory_space<vmem>>, vector<128x128xbf16>
    %cst = arith.constant dense<0.000000e+00> : vector<8x128xf32>
    %2 = tpu.matmul %0, %1, %cst {dimension_numbers = #tpu.dot_dimension_numbers<[1], [0], [0], [1], [0, 0, 1, 1], [], []>} : vector<8x128xbf16>, vector<128x128xbf16>, vector<8x128xf32> -> vector<8x128xf32>
    %c0_3 = arith.constant 0 : index
    %c0_4 = arith.constant 0 : index
    %3 = vector.load %arg3[%c0_3, %c0_4] : memref<1x128xf32, #tpu.memory_space<vmem>>, vector<1x128xf32>
    %4 = vector.broadcast %3 : vector<1x128xf32> to vector<8x128xf32>
    %5 = arith.addf %2, %4 : vector<8x128xf32>
    %cst_5 = arith.constant 0.000000e+00 : f32
    %6 = vector.broadcast %cst_5 : f32 to vector<8x128xf32>
    %7 = arith.maximumf %5, %6 : vector<8x128xf32>
    %8 = arith.truncf %7 : vector<8x128xf32> to vector<8x128xbf16>
    %c0_6 = arith.constant 0 : index
    %c0_7 = arith.constant 0 : index
    %9 = vector.load %arg4[%c0_6, %c0_7] : memref<128x128xbf16, #tpu.memory_space<vmem>>, vector<128x128xbf16>
    %cst_8 = arith.constant dense<0.000000e+00> : vector<8x128xf32>
    %10 = tpu.matmul %8, %9, %cst_8 {dimension_numbers = #tpu.dot_dimension_numbers<[1], [0], [0], [1], [0, 0, 1, 1], [], []>} : vector<8x128xbf16>, vector<128x128xbf16>, vector<8x128xf32> -> vector<8x128xf32>
    %c0_9 = arith.constant 0 : index
    %c0_10 = arith.constant 0 : index
    %11 = vector.load %arg5[%c0_9, %c0_10] : memref<1x128xf32, #tpu.memory_space<vmem>>, vector<1x128xf32>
    %12 = vector.broadcast %11 : vector<1x128xf32> to vector<8x128xf32>
    %13 = arith.addf %10, %12 : vector<8x128xf32>
    %14 = arith.truncf %13 : vector<8x128xf32> to vector<8x128xbf16>
    %c0_11 = arith.constant 0 : index
    %c0_12 = arith.constant 0 : index
    %15 = vector.load %arg6[%c0_11, %c0_12] : memref<8x128xbf16, #tpu.memory_space<vmem>>, vector<8x128xbf16>
    tpu.vector_store %arg6[%c0_11, %c0_12], %14 {strides = array<i32>} : memref<8x128xbf16, #tpu.memory_space<vmem>>, vector<8x128xbf16>,
    %16 = vector.shape_cast %7 : vector<8x128xf32> to vector<1x8x128xf32>
    %cst_13 = arith.constant dense<0.000000e+00> : vector<8x128xf32>
    %17 = vector.multi_reduction <add>, %16, %cst_13 [0] : vector<1x8x128xf32> to vector<8x128xf32>
    %c0_14 = arith.constant 0 : index
    %c0_15 = arith.constant 0 : index
    %18 = vector.load %arg7[%c0_14, %c0_15] : memref<8x128xf32, #tpu.memory_space<vmem>>, vector<8x128xf32>
    tpu.vector_store %arg7[%c0_14, %c0_15], %17 {strides = array<i32>} : memref<8x128xf32, #tpu.memory_space<vmem>>, vector<8x128xf32>,
    return
  }
  func.func @transform_0(%arg0: i32) -> (i32, i32) {
    %c0_i32 = arith.constant 0 : i32
    %c0_i32_0 = arith.constant 0 : i32
    return %arg0, %c0_i32 : i32, i32
  }
  func.func @transform_1(%arg0: i32) -> (i32, i32) {
    %c0_i32 = arith.constant 0 : i32
    %c0_i32_0 = arith.constant 0 : i32
    %c0_i32_1 = arith.constant 0 : i32
    return %c0_i32, %c0_i32_0 : i32, i32
  }
  func.func @transform_2(%arg0: i32) -> (i32, i32) {
    %c0_i32 = arith.constant 0 : i32
    %c0_i32_0 = arith.constant 0 : i32
    %c0_i32_1 = arith.constant 0 : i32
    return %c0_i32, %c0_i32_0 : i32, i32
  }
  func.func @transform_3(%arg0: i32) -> (i32, i32) {
    %c0_i32 = arith.constant 0 : i32
    %c0_i32_0 = arith.constant 0 : i32
    %c0_i32_1 = arith.constant 0 : i32
    return %c0_i32, %c0_i32_0 : i32, i32
  }
  func.func @transform_4(%arg0: i32) -> (i32, i32) {
    %c0_i32 = arith.constant 0 : i32
    %c0_i32_0 = arith.constant 0 : i32
    %c0_i32_1 = arith.constant 0 : i32
    return %c0_i32, %c0_i32_0 : i32, i32
  }
  func.func @transform_5(%arg0: i32) -> (i32, i32) {
    %c0_i32 = arith.constant 0 : i32
    %c0_i32_0 = arith.constant 0 : i32
    return %arg0, %c0_i32 : i32, i32
  }
  func.func @transform_6(%arg0: i32) -> (i32, i32) {
    %c0_i32 = arith.constant 0 : i32
    %c0_i32_0 = arith.constant 0 : i32
    return %arg0, %c0_i32 : i32, i32
  }
}

</mosaic_0001>

<bundles_post_ra>
// kernel: tpu_custom_call.1
= control target key start
LH: loop header
LB: loop body
LE: loop exit
PB: predicated region body
PF: predicated region fallthrough
CT: control target
= control target key end

     0   :  { %12 = vsyncpa [#allocation3], 0  ;;  %s658_s0 = inlined_call_operand.hbm [shape: bf16[8,128], index: 0, kind: input, shape index: {}]   ;;  %s659_s1 = inlined_call_operand.hbm [shape: bf16[128,128], index: 1, kind: input, shape index: {}]   ;;  %s660_s2 = inlined_call_operand.vmem [shape: f32[1,128], index: 2, kind: input, shape index: {}]   ;;  %s661_s3 = inlined_call_operand.hbm [shape: bf16[128,128], index: 3, kind: input, shape index: {}]   ;;  %s662_s4 = inlined_call_operand.vmem [shape: f32[1,128], index: 4, kind: input, shape index: {}]   ;;  %s663_s5 = inlined_call_operand.hbm [shape: bf16[8,128], index: 5, kind: output, shape index: {0}]   ;;  %s664_s6 = inlined_call_operand.hbm [shape: f32[8,128], index: 6, kind: output, shape index: {1}]  }
   0x1   :  { %13 = vsyncpa [#allocation6], 0 }
   0x2   :  { %14 = vsyncpa [#allocation4], 0 }
   0x3   :  { %15 = vsyncpa [#allocation10], 0  ;;  %s542_s21 = smov [#allocation5]   ;;  %s424_s25 = scalar_lea.hbm %s659_s1, 1024 }
   0x4   :  { %s31_s22 = sshll.u32 %s542_s21, 4  ;;  %p425_p0 = scmp.ne.s32.totalorder %s659_s1, %s424_s25  ;;  %s32_s22 = int_to_ptr.vmem [resolvable:$true] %s31_s22 }
   0x5   :  { %p428_p1 = scmp.lt.u32.totalorder %s424_s25, %s659_s1 }
   0x7   :  { %p430_p2 = pnand %p428_p1, %p425_p0 }
   0x9   :  { %433 = shalt.err (!%p430_p2)
}
   0xa   :  { %s434_s30 = scalar_lea.vmem %s32_s22, 1024  ;;  %p439_p4 = scmp.lt.s32.totalorder %s32_s22, %s32_s22 }
   0xb   :  { %p435_p3 = scmp.ne.s32.totalorder %s32_s22, %s434_s30  ;;  %p440_p5 = scmp.lt.s32.totalorder %s434_s30, %s434_s30 }
   0xd   :  { %p441_p6 = por %p440_p5, %p439_p4 }
   0xf   :  { %p442_p7 = pnand %p441_p6, %p435_p3 }
  0x11   :  { %445 = shalt.err (!%p442_p7)
}
  0x12   :  { %s543_s7 = smov 64   ;;  %s544_s8 = smov 4  }
  0x13   :  { %37 = dma.hbm_to_vmem [thread:$0]  %s659_s1, 1024, %s32_s22, [#allocation6], %s543_s7, %s543_s7, %s544_s8  }
  0x14   :  { %s545_s11 = smov [#allocation2]   ;;  %s546_s13 = smov [#allocation7]  }
  0x15   :  { %s22_s12 = sshll.u32 %s545_s11, 4  ;;  %s45_s14 = sshll.u32 %s546_s13, 4  ;;  %s23_s12 = int_to_ptr.vmem [resolvable:$true] %s22_s12  ;;  %s46_s14 = int_to_ptr.vmem [resolvable:$true] %s45_s14 }
  0x16   :  { %s446_s17 = scalar_lea.hbm %s658_s0, 64 }
  0x17   :  { %p447_p8 = scmp.ne.s32.totalorder %s658_s0, %s446_s17  ;;  %p450_p9 = scmp.lt.u32.totalorder %s446_s17, %s658_s0 }
  0x19   :  { %p452_p10 = pnand %p450_p9, %p447_p8 }
  0x1b   :  { %455 = shalt.err (!%p452_p10)
}
  0x1c   :  { %s456_s1 = scalar_lea.vmem %s23_s12, 64  ;;  %p461_p12 = scmp.lt.s32.totalorder %s23_s12, %s23_s12 }
  0x1d   :  { %p457_p11 = scmp.ne.s32.totalorder %s23_s12, %s456_s1  ;;  %p462_p13 = scmp.lt.s32.totalorder %s456_s1, %s456_s1 }
  0x1f   :  { %p463_p0 = por %p462_p13, %p461_p12 }
  0x21   :  { %p464_p1 = pnand %p463_p0, %p457_p11 }
  0x23   :  { %467 = shalt.err (!%p464_p1)
}
  0x24   :  { %25 = dma.hbm_to_vmem [thread:$0]  %s658_s0, 64, %s23_s12, [#allocation3]  }
  0x25   :  { %s468_s26 = scalar_lea.hbm %s661_s3, 1024 }
  0x26   :  { %p469_p2 = scmp.ne.s32.totalorder %s661_s3, %s468_s26  ;;  %p472_p3 = scmp.lt.u32.totalorder %s468_s26, %s661_s3 }
  0x28   :  { %p474_p4 = pnand %p472_p3, %p469_p2 }
  0x2a   :  { %477 = shalt.err (!%p474_p4)
}
  0x2b   :  { %s478_s9 = scalar_lea.vmem %s46_s14, 1024  ;;  %p483_p6 = scmp.lt.s32.totalorder %s46_s14, %s46_s14 }
  0x2c   :  { %p479_p5 = scmp.ne.s32.totalorder %s46_s14, %s478_s9  ;;  %p484_p7 = scmp.lt.s32.totalorder %s478_s9, %s478_s9 }
  0x2e   :  { %p485_p8 = por %p484_p7, %p483_p6 }
  0x30   :  { %p486_p9 = pnand %p485_p8, %p479_p5 }
  0x32   :  { %489 = shalt.err (!%p486_p9)
}
  0x33   :  { %51 = dma.hbm_to_vmem [thread:$0]  %s661_s3, 1024, %s46_s14, [#allocation6], %s543_s7, %s543_s7, %s544_s8  }
  0x34   :  { %534 = dma.done.wait [#allocation3], 64  }
  0x35   :  { %535 = vsyncadd [#allocation3], 4294967232 }
  0x36   :  { %536 = dma.done.wait [#allocation6], 2048  }
  0x37   :  { %537 = vsyncadd [#allocation6], 4294965248  ;;  %v547_v0 = vmov 0.0   ;;  %vm548_vm0 = vmmov 0   ;;  %v408_v1 = vld [vmem:[#allocation5] sm:$0xff]   ;;  %v409_v2 = vld [vmem:[#allocation5 + $0x8] sm:$0xff]  }
  0x38   :  { %359 = vmatprep.subr.bf16.mxu0 %v547_v0  ;;  %375 = vmatprep.mubr.msk.bf16.mxu0 %vm548_vm0, %v547_v0  ;;  %v410_v3 = vld [vmem:[#allocation5 + $0x10] sm:$0xff]   ;;  %v416_v4 = vld [vmem:[#allocation7] sm:$0xff]   ;;  %v411_v5 = vld [vmem:[#allocation5 + $0x18] sm:$0xff]   ;;  %s549_s8 = smov [#allocation9]  }
  0x39   :  { %379 = vmatprep.subr.bf16.mxu1 %v547_v0  ;;  %395 = vmatprep.mubr.msk.bf16.mxu1 %vm548_vm0, %v547_v0  ;;  %v417_v6 = vld [vmem:[#allocation7 + $0x8] sm:$0xff]   ;;  %v412_v7 = vld [vmem:[#allocation5 + $0x20] sm:$0xff]   ;;  %v418_v8 = vld [vmem:[#allocation7 + $0x10] sm:$0xff]   ;;  %s309_s11 = sshll.u32 %s549_s8, 4  ;;  %s310_s11 = int_to_ptr.vmem [resolvable:$true] %s309_s11 }
  0x3a   :  { %360 = vmatpush3.bf16.msra.mxu0 %v408_v1  ;;  %380 = vmatpush3.bf16.msra.mxu1 %v416_v4  ;;  %v413_v9 = vld [vmem:[#allocation5 + $0x28] sm:$0xff]   ;;  %v419_v10 = vld [vmem:[#allocation7 + $0x18] sm:$0xff]   ;;  %v414_v11 = vld [vmem:[#allocation5 + $0x30] sm:$0xff]   ;;  %s490_s12 = scalar_lea.vmem %s310_s11, 128  ;;  %p495_p11 = scmp.lt.s32.totalorder %s310_s11, %s310_s11 }
  0x3b   :  { %361 = vmatprep.subr.bf16.mxu0 %v547_v0  ;;  %381 = vmatprep.subr.bf16.mxu1 %v547_v0  ;;  %v420_v12 = vld [vmem:[#allocation7 + $0x20] sm:$0xff]   ;;  %v415_v13 = vld [vmem:[#allocation5 + $0x38] sm:$0xff]   ;;  %v421_v14 = vld [vmem:[#allocation7 + $0x28] sm:$0xff]   ;;  %p491_p10 = scmp.ne.s32.totalorder %s310_s11, %s490_s12  ;;  %p496_p12 = scmp.lt.s32.totalorder %s490_s12, %s490_s12 }
  0x3c   :  { %v64_v15 = vld [vmem:[#allocation2] sm:$0xf]  ;;  %v422_v16 = vld [vmem:[#allocation7 + $0x30] sm:$0xff]  }
  0x3d   :  { %v423_v17 = vld [vmem:[#allocation7 + $0x38] sm:$0xff]   ;;  %p497_p13 = por %p496_p12, %p495_p11 }
  0x3e   :  { %362 = vmatpush3.bf16.msra.mxu0 %v409_v2  ;;  %382 = vmatpush3.bf16.msra.mxu1 %v417_v6  ;;  %v323_v18 = vld [vmem:[%s660_s2] ss:$0 sm:$0xff] }
  0x3f   :  { %363 = vmatprep.subr.bf16.mxu0 %v547_v0  ;;  %383 = vmatprep.subr.bf16.mxu1 %v547_v0  ;;  %p498_p0 = pnand %p497_p13, %p491_p10 }
  0x42   :  { %364 = vmatpush3.bf16.msra.mxu0 %v410_v3  ;;  %384 = vmatpush3.bf16.msra.mxu1 %v418_v8 }
  0x43   :  { %365 = vmatprep.subr.bf16.mxu0 %v547_v0  ;;  %385 = vmatprep.subr.bf16.mxu1 %v547_v0 }
  0x46   :  { %366 = vmatpush3.bf16.msra.mxu0 %v411_v5  ;;  %386 = vmatpush3.bf16.msra.mxu1 %v419_v10 }
  0x47   :  { %367 = vmatprep.subr.bf16.mxu0 %v547_v0  ;;  %387 = vmatprep.subr.bf16.mxu1 %v547_v0 }
  0x4a   :  { %368 = vmatpush3.bf16.msra.mxu0 %v412_v7  ;;  %388 = vmatpush3.bf16.msra.mxu1 %v420_v12 }
  0x4b   :  { %369 = vmatprep.subr.bf16.mxu0 %v547_v0  ;;  %389 = vmatprep.subr.bf16.mxu1 %v547_v0 }
  0x4e   :  { %370 = vmatpush3.bf16.msra.mxu0 %v413_v9  ;;  %390 = vmatpush3.bf16.msra.mxu1 %v421_v14 }
  0x4f   :  { %371 = vmatprep.subr.bf16.mxu0 %v547_v0  ;;  %391 = vmatprep.subr.bf16.mxu1 %v547_v0 }
  0x52   :  { %372 = vmatpush3.bf16.msra.mxu0 %v414_v11  ;;  %392 = vmatpush3.bf16.msra.mxu1 %v422_v16 }
  0x53   :  { %373 = vmatprep.subr.bf16.mxu0 %v547_v0  ;;  %393 = vmatprep.subr.bf16.mxu1 %v547_v0 }
  0x56   :  { %374 = vmatpush3.bf16.msra.mxu0 %v415_v13  ;;  %394 = vmatpush3.bf16.msra.mxu1 %v423_v17 }
  0x59   :  { %376 = vmatmul.mubr.bf16.vlgmr.msra.gmra.mrb[0].mxu0 %v64_v15 }
 0x12c   :  { %v170_v19 = vpop.f32.mrb[0].mxu0 }
 0x12d   :  { %v171_v20 = vadd.f32 %v323_v18, %v170_v19  ;;  %v377_v21 = vpop.f32.mrb[1].mxu0 }
 0x12e   :  { %v173_v22 = vpop.f32.mrb[2].mxu0 }
 0x12f   :  { %v176_v23 = vmax.f32 %v171_v20, 0.0  ;;  %v378_v24 = vpop.f32.mrb[3].mxu0 }
 0x131   :  { %v177_v25 = vpack.c.bf16 %v176_v23, %v176_v23  ;;  %292 = vst [vmem:[#allocation9] sm:$0xff] %v176_v23 }
 0x133   :  { %396 = vmatmul.mubr.bf16.vlgmr.msra.gmra.mrb[0].mxu1 %v177_v25 }
 0x134   :  { %501 = shalt.err (!%p498_p0)
}
 0x135   :  { %s502_s14 = scalar_lea.hbm %s664_s6, 128 }
 0x136   :  { %p503_p1 = scmp.ne.s32.totalorder %s664_s6, %s502_s14  ;;  %p506_p2 = scmp.lt.u32.totalorder %s502_s14, %s664_s6 }
 0x138   :  { %p508_p3 = pnand %p506_p2, %p503_p1 }
 0x13a   :  { %511 = shalt.err (!%p508_p3)
}
 0x13b   :  { %312 = dma.vmem_to_hbm [thread:$0]  %s310_s11, 128, %s664_s6, [#allocation10]   ;;  %v332_v26 = vld [vmem:[%s662_s4] ss:$0 sm:$0xff] }
 0x13c   :  { %s550_s22 = smov [#allocation8]  }
 0x13d   :  { %s299_s23 = sshll.u32 %s550_s22, 4  ;;  %s300_s23 = int_to_ptr.vmem [resolvable:$true] %s299_s23 }
 0x13e   :  { %s512_s24 = scalar_lea.vmem %s300_s23, 64  ;;  %p517_p5 = scmp.lt.s32.totalorder %s300_s23, %s300_s23 }
 0x13f   :  { %p513_p4 = scmp.ne.s32.totalorder %s300_s23, %s512_s24  ;;  %p518_p6 = scmp.lt.s32.totalorder %s512_s24, %s512_s24 }
 0x141   :  { %p519_p7 = por %p518_p6, %p517_p5 }
 0x143   :  { %p520_p8 = pnand %p519_p7, %p513_p4 }
 0x206   :  { %v283_v27 = vpop.f32.mrb[0].mxu1 }
 0x207   :  { %v284_v28 = vadd.f32 %v332_v26, %v283_v27  ;;  %v397_v29 = vpop.f32.mrb[1].mxu1 }
 0x208   :  { %v286_v30 = vpop.f32.mrb[2].mxu1 }
 0x209   :  { %v289_v31 = vpack.c.bf16 %v284_v28, %v284_v28  ;;  %v398_v32 = vpop.f32.mrb[3].mxu1 }
 0x20b   :  { %290 = vst [vmem:[#allocation8] sm:$0xf] %v289_v31 }
 0x20c   :  { %523 = shalt.err (!%p520_p8)
}
 0x20d   :  { %s524_s4 = scalar_lea.hbm %s663_s5, 64 }
 0x20e   :  { %p525_p9 = scmp.ne.s32.totalorder %s663_s5, %s524_s4  ;;  %p528_p10 = scmp.lt.u32.totalorder %s524_s4, %s663_s5 }
 0x210   :  { %p530_p11 = pnand %p528_p10, %p525_p9 }
 0x212   :  { %533 = shalt.err (!%p530_p11)
}
 0x213   :  { %302 = dma.vmem_to_hbm [thread:$0]  %s300_s23, 64, %s663_s5, [#allocation4]  }
 0x214   :  { %538 = dma.done.wait [#allocation4], 64  }
 0x215   :  { %539 = vsyncadd [#allocation4], 4294967232 }
 0x216   :  { %540 = dma.done.wait [#allocation10], 128  }
 0x217   :  { %541 = vsyncadd [#allocation10], 4294967168 }
 0x218   :  { %319 = vsyncpa [#allocation3], 1 }
 0x219   :  { %320 = vsyncpa [#allocation6], 1 }
 0x21a   :  { %321 = vsyncpa [#allocation4], 1 }
 0x21b   :  { %322 = vsyncpa [#allocation10], 1 }

// kernel: tpu_custom_call.1
= control target key start
LH: loop header
LB: loop body
LE: loop exit
PB: predicated region body
PF: predicated region fallthrough
CT: control target
= control target key end

     0   :  { %12 = vsyncpa [#allocation3], 0  ;;  %s658_s0 = inlined_call_operand.hbm [shape: bf16[8,128], index: 0, kind: input, shape index: {}]   ;;  %s659_s1 = inlined_call_operand.hbm [shape: bf16[128,128], index: 1, kind: input, shape index: {}]   ;;  %s660_s2 = inlined_call_operand.vmem [shape: f32[1,128], index: 2, kind: input, shape index: {}]   ;;  %s661_s3 = inlined_call_operand.hbm [shape: bf16[128,128], index: 3, kind: input, shape index: {}]   ;;  %s662_s4 = inlined_call_operand.vmem [shape: f32[1,128], index: 4, kind: input, shape index: {}]   ;;  %s663_s5 = inlined_call_operand.hbm [shape: bf16[8,128], index: 5, kind: output, shape index: {0}]   ;;  %s664_s6 = inlined_call_operand.hbm [shape: f32[8,128], index: 6, kind: output, shape index: {1}]  }
   0x1   :  { %13 = vsyncpa [#allocation6], 0 }
   0x2   :  { %14 = vsyncpa [#allocation4], 0 }
   0x3   :  { %15 = vsyncpa [#allocation10], 0  ;;  %s542_s21 = smov [#allocation5]   ;;  %s424_s25 = scalar_lea.hbm %s659_s1, 1024 }
   0x4   :  { %s31_s22 = sshll.u32 %s542_s21, 4  ;;  %p425_p0 = scmp.ne.s32.totalorder %s659_s1, %s424_s25  ;;  %s32_s22 = int_to_ptr.vmem [resolvable:$true] %s31_s22 }
   0x5   :  { %p428_p1 = scmp.lt.u32.totalorder %s424_s25, %s659_s1 }
   0x7   :  { %p430_p2 = pnand %p428_p1, %p425_p0 }
   0x9   :  { %433 = shalt.err (!%p430_p2)
}
   0xa   :  { %s434_s30 = scalar_lea.vmem %s32_s22, 1024  ;;  %p439_p4 = scmp.lt.s32.totalorder %s32_s22, %s32_s22 }
   0xb   :  { %p435_p3 = scmp.ne.s32.totalorder %s32_s22, %s434_s30  ;;  %p440_p5 = scmp.lt.s32.totalorder %s434_s30, %s434_s30 }
   0xd   :  { %p441_p6 = por %p440_p5, %p439_p4 }
   0xf   :  { %p442_p7 = pnand %p441_p6, %p435_p3 }
  0x11   :  { %445 = shalt.err (!%p442_p7)
}
  0x12   :  { %s543_s7 = smov 64   ;;  %s544_s8 = smov 4  }
  0x13   :  { %37 = dma.hbm_to_vmem [thread:$0]  %s659_s1, 1024, %s32_s22, [#allocation6], %s543_s7, %s543_s7, %s544_s8  }
  0x14   :  { %s545_s11 = smov [#allocation2]   ;;  %s546_s13 = smov [#allocation7]  }
  0x15   :  { %s22_s12 = sshll.u32 %s545_s11, 4  ;;  %s45_s14 = sshll.u32 %s546_s13, 4  ;;  %s23_s12 = int_to_ptr.vmem [resolvable:$true] %s22_s12  ;;  %s46_s14 = int_to_ptr.vmem [resolvable:$true] %s45_s14 }
  0x16   :  { %s446_s17 = scalar_lea.hbm %s658_s0, 64 }
  0x17   :  { %p447_p8 = scmp.ne.s32.totalorder %s658_s0, %s446_s17  ;;  %p450_p9 = scmp.lt.u32.totalorder %s446_s17, %s658_s0 }
  0x19   :  { %p452_p10 = pnand %p450_p9, %p447_p8 }
  0x1b   :  { %455 = shalt.err (!%p452_p10)
}
  0x1c   :  { %s456_s1 = scalar_lea.vmem %s23_s12, 64  ;;  %p461_p12 = scmp.lt.s32.totalorder %s23_s12, %s23_s12 }
  0x1d   :  { %p457_p11 = scmp.ne.s32.totalorder %s23_s12, %s456_s1  ;;  %p462_p13 = scmp.lt.s32.totalorder %s456_s1, %s456_s1 }
  0x1f   :  { %p463_p0 = por %p462_p13, %p461_p12 }
  0x21   :  { %p464_p1 = pnand %p463_p0, %p457_p11 }
  0x23   :  { %467 = shalt.err (!%p464_p1)
}
  0x24   :  { %25 = dma.hbm_to_vmem [thread:$0]  %s658_s0, 64, %s23_s12, [#allocation3]  }
  0x25   :  { %s468_s26 = scalar_lea.hbm %s661_s3, 1024 }
  0x26   :  { %p469_p2 = scmp.ne.s32.totalorder %s661_s3, %s468_s26  ;;  %p472_p3 = scmp.lt.u32.totalorder %s468_s26, %s661_s3 }
  0x28   :  { %p474_p4 = pnand %p472_p3, %p469_p2 }
  0x2a   :  { %477 = shalt.err (!%p474_p4)
}
  0x2b   :  { %s478_s9 = scalar_lea.vmem %s46_s14, 1024  ;;  %p483_p6 = scmp.lt.s32.totalorder %s46_s14, %s46_s14 }
  0x2c   :  { %p479_p5 = scmp.ne.s32.totalorder %s46_s14, %s478_s9  ;;  %p484_p7 = scmp.lt.s32.totalorder %s478_s9, %s478_s9 }
  0x2e   :  { %p485_p8 = por %p484_p7, %p483_p6 }
  0x30   :  { %p486_p9 = pnand %p485_p8, %p479_p5 }
  0x32   :  { %489 = shalt.err (!%p486_p9)
}
  0x33   :  { %51 = dma.hbm_to_vmem [thread:$0]  %s661_s3, 1024, %s46_s14, [#allocation6], %s543_s7, %s543_s7, %s544_s8  }
  0x34   :  { %534 = dma.done.wait [#allocation3], 64  }
  0x35   :  { %535 = vsyncadd [#allocation3], 4294967232 }
  0x36   :  { %536 = dma.done.wait [#allocation6], 2048  }
  0x37   :  { %537 = vsyncadd [#allocation6], 4294965248  ;;  %v547_v0 = vmov 0.0   ;;  %vm548_vm0 = vmmov 0   ;;  %v408_v1 = vld [vmem:[#allocation5] sm:$0xff]   ;;  %v409_v2 = vld [vmem:[#allocation5 + $0x8] sm:$0xff]  }
  0x38   :  { %359 = vmatprep.subr.bf16.mxu0 %v547_v0  ;;  %375 = vmatprep.mubr.msk.bf16.mxu0 %vm548_vm0, %v547_v0  ;;  %v410_v3 = vld [vmem:[#allocation5 + $0x10] sm:$0xff]   ;;  %v416_v4 = vld [vmem:[#allocation7] sm:$0xff]   ;;  %v411_v5 = vld [vmem:[#allocation5 + $0x18] sm:$0xff]   ;;  %s549_s8 = smov [#allocation9]  }
  0x39   :  { %379 = vmatprep.subr.bf16.mxu1 %v547_v0  ;;  %395 = vmatprep.mubr.msk.bf16.mxu1 %vm548_vm0, %v547_v0  ;;  %v417_v6 = vld [vmem:[#allocation7 + $0x8] sm:$0xff]   ;;  %v412_v7 = vld [vmem:[#allocation5 + $0x20] sm:$0xff]   ;;  %v418_v8 = vld [vmem:[#allocation7 + $0x10] sm:$0xff]   ;;  %s309_s11 = sshll.u32 %s549_s8, 4  ;;  %s310_s11 = int_to_ptr.vmem [resolvable:$true] %s309_s11 }
  0x3a   :  { %360 = vmatpush3.bf16.msra.mxu0 %v408_v1  ;;  %380 = vmatpush3.bf16.msra.mxu1 %v416_v4  ;;  %v413_v9 = vld [vmem:[#allocation5 + $0x28] sm:$0xff]   ;;  %v419_v10 = vld [vmem:[#allocation7 + $0x18] sm:$0xff]   ;;  %v414_v11 = vld [vmem:[#allocation5 + $0x30] sm:$0xff]   ;;  %s490_s12 = scalar_lea.vmem %s310_s11, 128  ;;  %p495_p11 = scmp.lt.s32.totalorder %s310_s11, %s310_s11 }
  0x3b   :  { %361 = vmatprep.subr.bf16.mxu0 %v547_v0  ;;  %381 = vmatprep.subr.bf16.mxu1 %v547_v0  ;;  %v420_v12 = vld [vmem:[#allocation7 + $0x20] sm:$0xff]   ;;  %v415_v13 = vld [vmem:[#allocation5 + $0x38] sm:$0xff]   ;;  %v421_v14 = vld [vmem:[#allocation7 + $0x28] sm:$0xff]   ;;  %p491_p10 = scmp.ne.s32.totalorder %s310_s11, %s490_s12  ;;  %p496_p12 = scmp.lt.s32.totalorder %s490_s12, %s490_s12 }
  0x3c   :  { %v64_v15 = vld [vmem:[#allocation2] sm:$0xf]  ;;  %v422_v16 = vld [vmem:[#allocation7 + $0x30] sm:$0xff]  }
  0x3d   :  { %v423_v17 = vld [vmem:[#allocation7 + $0x38] sm:$0xff]   ;;  %p497_p13 = por %p496_p12, %p495_p11 }
  0x3e   :  { %362 = vmatpush3.bf16.msra.mxu0 %v409_v2  ;;  %382 = vmatpush3.bf16.msra.mxu1 %v417_v6  ;;  %v323_v18 = vld [vmem:[%s660_s2] ss:$0 sm:$0xff] }
  0x3f   :  { %363 = vmatprep.subr.bf16.mxu0 %v547_v0  ;;  %383 = vmatprep.subr.bf16.mxu1 %v547_v0  ;;  %p498_p0 = pnand %p497_p13, %p491_p10 }
  0x42   :  { %364 = vmatpush3.bf16.msra.mxu0 %v410_v3  ;;  %384 = vmatpush3.bf16.msra.mxu1 %v418_v8 }
  0x43   :  { %365 = vmatprep.subr.bf16.mxu0 %v547_v0  ;;  %385 = vmatprep.subr.bf16.mxu1 %v547_v0 }
  0x46   :  { %366 = vmatpush3.bf16.msra.mxu0 %v411_v5  ;;  %386 = vmatpush3.bf16.msra.mxu1 %v419_v10 }
  0x47   :  { %367 = vmatprep.subr.bf16.mxu0 %v547_v0  ;;  %387 = vmatprep.subr.bf16.mxu1 %v547_v0 }
  0x4a   :  { %368 = vmatpush3.bf16.msra.mxu0 %v412_v7  ;;  %388 = vmatpush3.bf16.msra.mxu1 %v420_v12 }
  0x4b   :  { %369 = vmatprep.subr.bf16.mxu0 %v547_v0  ;;  %389 = vmatprep.subr.bf16.mxu1 %v547_v0 }
  0x4e   :  { %370 = vmatpush3.bf16.msra.mxu0 %v413_v9  ;;  %390 = vmatpush3.bf16.msra.mxu1 %v421_v14 }
  0x4f   :  { %371 = vmatprep.subr.bf16.mxu0 %v547_v0  ;;  %391 = vmatprep.subr.bf16.mxu1 %v547_v0 }
  0x52   :  { %372 = vmatpush3.bf16.msra.mxu0 %v414_v11  ;;  %392 = vmatpush3.bf16.msra.mxu1 %v422_v16 }
  0x53   :  { %373 = vmatprep.subr.bf16.mxu0 %v547_v0  ;;  %393 = vmatprep.subr.bf16.mxu1 %v547_v0 }
  0x56   :  { %374 = vmatpush3.bf16.msra.mxu0 %v415_v13  ;;  %394 = vmatpush3.bf16.msra.mxu1 %v423_v17 }
  0x59   :  { %376 = vmatmul.mubr.bf16.vlgmr.msra.gmra.mrb[0].mxu0 %v64_v15 }
 0x12c   :  { %v170_v19 = vpop.f32.mrb[0].mxu0 }
 0x12d   :  { %v171_v20 = vadd.f32 %v323_v18, %v170_v19  ;;  %v377_v21 = vpop.f32.mrb[1].mxu0 }
 0x12e   :  { %v173_v22 = vpop.f32.mrb[2].mxu0 }
 0x12f   :  { %v176_v23 = vmax.f32 %v171_v20, 0.0  ;;  %v378_v24 = vpop.f32.mrb[3].mxu0 }
 0x131   :  { %v177_v25 = vpack.c.bf16 %v176_v23, %v176_v23  ;;  %292 = vst [vmem:[#allocation9] sm:$0xff] %v176_v23 }
 0x133   :  { %396 = vmatmul.mubr.bf16.vlgmr.msra.gmra.mrb[0].mxu1 %v177_v25 }
 0x134   :  { %501 = shalt.err (!%p498_p0)
}
 0x135   :  { %s502_s14 = scalar_lea.hbm %s664_s6, 128 }
 0x136   :  { %p503_p1 = scmp.ne.s32.totalorder %s664_s6, %s502_s14  ;;  %p506_p2 = scmp.lt.u32.totalorder %s502_s14, %s664_s6 }
 0x138   :  { %p508_p3 = pnand %p506_p2, %p503_p1 }
 0x13a   :  { %511 = shalt.err (!%p508_p3)
}
 0x13b   :  { %312 = dma.vmem_to_hbm [thread:$0]  %s310_s11, 128, %s664_s6, [#allocation10]   ;;  %v332_v26 = vld [vmem:[%s662_s4] ss:$0 sm:$0xff] }
 0x13c   :  { %s550_s22 = smov [#allocation8]  }
 0x13d   :  { %s299_s23 = sshll.u32 %s550_s22, 4  ;;  %s300_s23 = int_to_ptr.vmem [resolvable:$true] %s299_s23 }
 0x13e   :  { %s512_s24 = scalar_lea.vmem %s300_s23, 64  ;;  %p517_p5 = scmp.lt.s32.totalorder %s300_s23, %s300_s23 }
 0x13f   :  { %p513_p4 = scmp.ne.s32.totalorder %s300_s23, %s512_s24  ;;  %p518_p6 = scmp.lt.s32.totalorder %s512_s24, %s512_s24 }
 0x141   :  { %p519_p7 = por %p518_p6, %p517_p5 }
 0x143   :  { %p520_p8 = pnand %p519_p7, %p513_p4 }
 0x206   :  { %v283_v27 = vpop.f32.mrb[0].mxu1 }
 0x207   :  { %v284_v28 = vadd.f32 %v332_v26, %v283_v27  ;;  %v397_v29 = vpop.f32.mrb[1].mxu1 }
 0x208   :  { %v286_v30 = vpop.f32.mrb[2].mxu1 }
 0x209   :  { %v289_v31 = vpack.c.bf16 %v284_v28, %v284_v28  ;;  %v398_v32 = vpop.f32.mrb[3].mxu1 }
 0x20b   :  { %290 = vst [vmem:[#allocation8] sm:$0xf] %v289_v31 }
 0x20c   :  { %523 = shalt.err (!%p520_p8)
}
 0x20d   :  { %s524_s4 = scalar_lea.hbm %s663_s5, 64 }
 0x20e   :  { %p525_p9 = scmp.ne.s32.totalorder %s663_s5, %s524_s4  ;;  %p528_p10 = scmp.lt.u32.totalorder %s524_s4, %s663_s5 }
 0x210   :  { %p530_p11 = pnand %p528_p10, %p525_p9 }
 0x212   :  { %533 = shalt.err (!%p530_p11)
}
 0x213   :  { %302 = dma.vmem_to_hbm [thread:$0]  %s300_s23, 64, %s663_s5, [#allocation4]  }
 0x214   :  { %538 = dma.done.wait [#allocation4], 64  }
 0x215   :  { %539 = vsyncadd [#allocation4], 4294967232 }
 0x216   :  { %540 = dma.done.wait [#allocation10], 128  }
 0x217   :  { %541 = vsyncadd [#allocation10], 4294967168 }
 0x218   :  { %319 = vsyncpa [#allocation3], 1 }
 0x219   :  { %320 = vsyncpa [#allocation6], 1 }
 0x21a   :  { %321 = vsyncpa [#allocation4], 1 }
 0x21b   :  { %322 = vsyncpa [#allocation10], 1 }

</bundles_post_ra>
